<compile_context>
chip_gen: v5e
topology: v5e:2x2
jax: 0.10.0
libtpu: 0.0.40
codegen_flags: <defaults>
</compile_context>

<pallas_src>
import functools

import jax
import jax.numpy as jnp
from jax.experimental import pallas as pl
from jax.experimental.pallas import tpu as pltpu

# hyperparameters (chosen from the module's candidate lists, small for testing)
N_EMBD = 32          # n_embd
BLOCK_SIZE = 16      # block_size (max T)
NUM_HEADS = 4
HEAD_SIZE = N_EMBD // NUM_HEADS   # 8
BATCH = 2
T = 8                # actual sequence length (T <= BLOCK_SIZE)


def mha_kernel(xf_ref, wqkv_ref, wp_ref, bp_ref, mask_ref, o_ref, *, H, hs):
    """Fused causal multi-head attention + output projection, whole batch in one shot.

    xf_ref:   (B*T, C)    flattened input (f32)
    wqkv_ref: (C, 3*C)    fused [Wq*scale | Wk | Wv] (bf16), heads stacked along lanes
    wp_ref:   (C, C)      output projection, transposed (bf16)
    bp_ref:   (1, C)      output projection bias (f32)
    mask_ref: (B*T, B*T)  block-diagonal causal ADDITIVE mask: 0 keep / -1e30 drop (f32)
    o_ref:    (B*T, C)
    """
    C = H * hs
    xf = xf_ref[...].astype(jnp.bfloat16)                                  # (BT, C)

    # One fused bf16 projection matmul for q/k/v over the whole batch.
    qkv = jnp.dot(xf, wqkv_ref[...], preferred_element_type=jnp.float32)  # (BT, 3C) f32

    maskadd = mask_ref[...]                                                # (BT, BT) f32

    head_outs = []
    for h in range(H):                                  # static unrolled loop over heads (H=4)
        c0 = h * hs
        q = qkv[:, c0:c0 + hs].astype(jnp.bfloat16)            # (BT, hs), scale folded into Wq
        k = qkv[:, C + c0:C + c0 + hs].astype(jnp.bfloat16)    # (BT, hs)
        v = qkv[:, 2 * C + c0:2 * C + c0 + hs].astype(jnp.bfloat16)

        # scores over ALL batch rows at once; cross-batch entries killed by the additive mask
        s = jnp.dot(q, k.T, preferred_element_type=jnp.float32)            # (BT, BT)
        s = s + maskadd

        # numerically-stable softmax in f32; reciprocal on the EUP instead of a VALU divide
        m = jnp.max(s, axis=-1, keepdims=True)
        e = jnp.exp(s - m)
        p = e * pl.reciprocal(jnp.sum(e, axis=-1, keepdims=True), approx=True)

        hv = jnp.dot(p.astype(jnp.bfloat16), v, preferred_element_type=jnp.float32)  # (BT, hs)
        head_outs.append(hv)

    # Lane-concat of head outputs (XLU has slack) -> ONE output-projection matmul (K=C=32).
    concat = jnp.concatenate(head_outs, axis=-1).astype(jnp.bfloat16)      # (BT, C)
    out = jnp.dot(concat, wp_ref[...], preferred_element_type=jnp.float32) + bp_ref[...]
    o_ref[...] = out.astype(o_ref.dtype)


def multi_head_attention(x, wq, wk, wv, wp, bp):
    """x: (B, T, C); wq/wk/wv: (H, C, hs); wp: (C, C) transposed; bp: (1, C) -> (B, T, C)."""
    B, Tt, C = x.shape
    H, _, hs = wq.shape
    scale = C ** (-0.5)                      # PyTorch module scales scores by n_embd**-0.5

    # Fuse per-head q/k/v weights into one (C, 3C) matrix (heads stacked along lanes);
    # fold the score scale into Wq; cast weights to bf16 for single-pass MXU matmuls.
    def stack_heads(w):                      # (H, C, hs) -> (C, H*hs)
        return jnp.transpose(w, (1, 0, 2)).reshape(C, H * hs)

    wqkv = jnp.concatenate(
        [stack_heads(wq) * scale, stack_heads(wk), stack_heads(wv)], axis=-1
    ).astype(jnp.bfloat16)
    wp_b = wp.astype(jnp.bfloat16)

    xf = x.reshape(B * Tt, C)                # flatten batch/seq for the merged matmuls

    # Block-diagonal causal additive mask, built once in the wrapper (constant, hoisted).
    row = jnp.arange(B * Tt)[:, None]
    col = jnp.arange(B * Tt)[None, :]
    keep = (row // Tt == col // Tt) & ((col % Tt) <= (row % Tt))
    maskadd = jnp.where(keep, 0.0, -1e30).astype(jnp.float32)

    kernel = functools.partial(mha_kernel, H=H, hs=hs)
    out_flat = pl.pallas_call(
        kernel,
        out_shape=jax.ShapeDtypeStruct((B * Tt, C), x.dtype),
        # No grid: single invocation, everything resident in VMEM, no pipeline scaffolding.
        in_specs=[
            pl.BlockSpec(memory_space=pltpu.MemorySpace.VMEM),   # xf
            pl.BlockSpec(memory_space=pltpu.MemorySpace.VMEM),   # fused Wqkv (bf16)
            pl.BlockSpec(memory_space=pltpu.MemorySpace.VMEM),   # Wproj (bf16)
            pl.BlockSpec(memory_space=pltpu.MemorySpace.VMEM),   # bproj
            pl.BlockSpec(memory_space=pltpu.MemorySpace.VMEM),   # additive causal mask
        ],
        out_specs=pl.BlockSpec(memory_space=pltpu.MemorySpace.VMEM),
    )(xf, wqkv, wp_b, bp, maskadd)
    return out_flat.reshape(B, Tt, C)


def reference(x, wq, wk, wv, wp, bp):
    """Plain-JAX (f32) reference matching the PyTorch forward (eval mode)."""
    B, Tt, C = x.shape
    outs = []
    for h in range(wq.shape[0]):
        q = x @ wq[h]
        k = x @ wk[h]
        v = x @ wv[h]
        wei = (q @ jnp.swapaxes(k, -2, -1)) * (C ** -0.5)
        mask = jnp.tril(jnp.ones((Tt, Tt), dtype=bool))
        wei = jnp.where(mask, wei, -jnp.inf)
        wei = jax.nn.softmax(wei, axis=-1)
        outs.append(wei @ v)
    concat = jnp.concatenate(outs, axis=-1)
    return concat @ wp + bp


if __name__ == "__main__":
    key = jax.random.PRNGKey(0)
    kx, kq, kk, kv, kp, kb = jax.random.split(key, 6)

    # deterministic synthetic parameters (shapes implied by the module's __init__)
    x = jax.random.normal(kx, (BATCH, T, N_EMBD), dtype=jnp.float32)
    wq = jax.random.normal(kq, (NUM_HEADS, N_EMBD, HEAD_SIZE), dtype=jnp.float32) * 0.1
    wk = jax.random.normal(kk, (NUM_HEADS, N_EMBD, HEAD_SIZE), dtype=jnp.float32) * 0.1
    wv = jax.random.normal(kv, (NUM_HEADS, N_EMBD, HEAD_SIZE), dtype=jnp.float32) * 0.1
    wp = jax.random.normal(kp, (N_EMBD, N_EMBD), dtype=jnp.float32) * 0.1
    bp = jax.random.normal(kb, (1, N_EMBD), dtype=jnp.float32) * 0.1

    out = multi_head_attention(x, wq, wk, wv, wp, bp)
    out = jax.block_until_ready(out)

    ref = reference(x, wq, wk, wv, wp, bp)
    assert out.shape == (BATCH, T, N_EMBD)
    # tolerance loosened for bf16 MXU operands + EUP approx reciprocal (f32 reference)
    assert jnp.allclose(out, ref, atol=5e-2, rtol=5e-2), "mismatch vs reference"

    print("KERNEL_OK")
</pallas_src>

<mosaic_0001>
module attributes {stable_mosaic.version = 11 : i64} {
  func.func @mha_kernel(%arg0: memref<16x32xf32, #tpu.memory_space<vmem>>, %arg1: memref<32x96xbf16, #tpu.memory_space<vmem>>, %arg2: memref<32x32xbf16, #tpu.memory_space<vmem>>, %arg3: memref<1x32xf32, #tpu.memory_space<vmem>>, %arg4: memref<16x16xf32, #tpu.memory_space<vmem>>, %arg5: memref<16x32xf32, #tpu.memory_space<vmem>>) attributes {dimension_semantics = [], scalar_prefetch = 0 : i64, scratch_operands = 0 : i64, tpu.core_type = #tpu.core_type<tc>} {
    %c0 = arith.constant 0 : index
    %c0_0 = arith.constant 0 : index
    %0 = vector.load %arg0[%c0, %c0_0] : memref<16x32xf32, #tpu.memory_space<vmem>>, vector<16x32xf32>
    %1 = arith.truncf %0 : vector<16x32xf32> to vector<16x32xbf16>
    %c0_1 = arith.constant 0 : index
    %c0_2 = arith.constant 0 : index
    %2 = vector.load %arg1[%c0_1, %c0_2] : memref<32x96xbf16, #tpu.memory_space<vmem>>, vector<32x96xbf16>
    %cst = arith.constant dense<0.000000e+00> : vector<16x96xf32>
    %3 = tpu.matmul %1, %2, %cst {dimension_numbers = #tpu.dot_dimension_numbers<[1], [0], [0], [1], [0, 0, 1, 1], [], []>} : vector<16x32xbf16>, vector<32x96xbf16>, vector<16x96xf32> -> vector<16x96xf32>
    %c0_3 = arith.constant 0 : index
    %c0_4 = arith.constant 0 : index
    %4 = vector.load %arg4[%c0_3, %c0_4] : memref<16x16xf32, #tpu.memory_space<vmem>>, vector<16x16xf32>
    %5 = vector.extract_strided_slice %3 {offsets = [0, 0], sizes = [16, 8], strides = [1, 1]} : vector<16x96xf32> to vector<16x8xf32>
    %6 = arith.truncf %5 : vector<16x8xf32> to vector<16x8xbf16>
    %7 = vector.extract_strided_slice %3 {offsets = [0, 32], sizes = [16, 8], strides = [1, 1]} : vector<16x96xf32> to vector<16x8xf32>
    %8 = arith.truncf %7 : vector<16x8xf32> to vector<16x8xbf16>
    %9 = vector.extract_strided_slice %3 {offsets = [0, 64], sizes = [16, 8], strides = [1, 1]} : vector<16x96xf32> to vector<16x8xf32>
    %10 = arith.truncf %9 : vector<16x8xf32> to vector<16x8xbf16>
    %11 = tpu.transpose %8, [1, 0] : vector<16x8xbf16> -> vector<8x16xbf16>
    %cst_5 = arith.constant dense<0.000000e+00> : vector<16x16xf32>
    %12 = tpu.matmul %6, %11, %cst_5 {dimension_numbers = #tpu.dot_dimension_numbers<[1], [0], [0], [1], [0, 0, 1, 1], [], []>} : vector<16x8xbf16>, vector<8x16xbf16>, vector<16x16xf32> -> vector<16x16xf32>
    %13 = arith.addf %12, %4 : vector<16x16xf32>
    %cst_6 = arith.constant dense<0xFF800000> : vector<16xf32>
    %14 = vector.multi_reduction <maximumf>, %13, %cst_6 [1] : vector<16x16xf32> to vector<16xf32>
    %15 = vector.shape_cast %14 : vector<16xf32> to vector<16x1xf32>
    %16 = vector.broadcast %15 : vector<16x1xf32> to vector<16x16xf32>
    %17 = arith.subf %13, %16 : vector<16x16xf32>
    %18 = math.exp %17 : vector<16x16xf32>
    %cst_7 = arith.constant dense<0.000000e+00> : vector<16xf32>
    %19 = vector.multi_reduction <add>, %18, %cst_7 [1] : vector<16x16xf32> to vector<16xf32>
    %20 = vector.shape_cast %19 : vector<16xf32> to vector<16x1xf32>
    %21 = tpu.reciprocal %20 {approx = true} : vector<16x1xf32> -> vector<16x1xf32>
    %22 = vector.broadcast %21 : vector<16x1xf32> to vector<16x16xf32>
    %23 = arith.mulf %18, %22 : vector<16x16xf32>
    %24 = arith.truncf %23 : vector<16x16xf32> to vector<16x16xbf16>
    %cst_8 = arith.constant dense<0.000000e+00> : vector<16x8xf32>
    %25 = tpu.matmul %24, %10, %cst_8 {dimension_numbers = #tpu.dot_dimension_numbers<[1], [0], [0], [1], [0, 0, 1, 1], [], []>} : vector<16x16xbf16>, vector<16x8xbf16>, vector<16x8xf32> -> vector<16x8xf32>
    %26 = vector.extract_strided_slice %3 {offsets = [0, 8], sizes = [16, 8], strides = [1, 1]} : vector<16x96xf32> to vector<16x8xf32>
    %27 = arith.truncf %26 : vector<16x8xf32> to vector<16x8xbf16>
    %28 = vector.extract_strided_slice %3 {offsets = [0, 40], sizes = [16, 8], strides = [1, 1]} : vector<16x96xf32> to vector<16x8xf32>
    %29 = arith.truncf %28 : vector<16x8xf32> to vector<16x8xbf16>
    %30 = vector.extract_strided_slice %3 {offsets = [0, 72], sizes = [16, 8], strides = [1, 1]} : vector<16x96xf32> to vector<16x8xf32>
    %31 = arith.truncf %30 : vector<16x8xf32> to vector<16x8xbf16>
    %32 = tpu.transpose %29, [1, 0] : vector<16x8xbf16> -> vector<8x16xbf16>
    %cst_9 = arith.constant dense<0.000000e+00> : vector<16x16xf32>
    %33 = tpu.matmul %27, %32, %cst_9 {dimension_numbers = #tpu.dot_dimension_numbers<[1], [0], [0], [1], [0, 0, 1, 1], [], []>} : vector<16x8xbf16>, vector<8x16xbf16>, vector<16x16xf32> -> vector<16x16xf32>
    %34 = arith.addf %33, %4 : vector<16x16xf32>
    %cst_10 = arith.constant dense<0xFF800000> : vector<16xf32>
    %35 = vector.multi_reduction <maximumf>, %34, %cst_10 [1] : vector<16x16xf32> to vector<16xf32>
    %36 = vector.shape_cast %35 : vector<16xf32> to vector<16x1xf32>
    %37 = vector.broadcast %36 : vector<16x1xf32> to vector<16x16xf32>
    %38 = arith.subf %34, %37 : vector<16x16xf32>
    %39 = math.exp %38 : vector<16x16xf32>
    %cst_11 = arith.constant dense<0.000000e+00> : vector<16xf32>
    %40 = vector.multi_reduction <add>, %39, %cst_11 [1] : vector<16x16xf32> to vector<16xf32>
    %41 = vector.shape_cast %40 : vector<16xf32> to vector<16x1xf32>
    %42 = tpu.reciprocal %41 {approx = true} : vector<16x1xf32> -> vector<16x1xf32>
    %43 = vector.broadcast %42 : vector<16x1xf32> to vector<16x16xf32>
    %44 = arith.mulf %39, %43 : vector<16x16xf32>
    %45 = arith.truncf %44 : vector<16x16xf32> to vector<16x16xbf16>
    %cst_12 = arith.constant dense<0.000000e+00> : vector<16x8xf32>
    %46 = tpu.matmul %45, %31, %cst_12 {dimension_numbers = #tpu.dot_dimension_numbers<[1], [0], [0], [1], [0, 0, 1, 1], [], []>} : vector<16x16xbf16>, vector<16x8xbf16>, vector<16x8xf32> -> vector<16x8xf32>
    %47 = vector.extract_strided_slice %3 {offsets = [0, 16], sizes = [16, 8], strides = [1, 1]} : vector<16x96xf32> to vector<16x8xf32>
    %48 = arith.truncf %47 : vector<16x8xf32> to vector<16x8xbf16>
    %49 = vector.extract_strided_slice %3 {offsets = [0, 48], sizes = [16, 8], strides = [1, 1]} : vector<16x96xf32> to vector<16x8xf32>
    %50 = arith.truncf %49 : vector<16x8xf32> to vector<16x8xbf16>
    %51 = vector.extract_strided_slice %3 {offsets = [0, 80], sizes = [16, 8], strides = [1, 1]} : vector<16x96xf32> to vector<16x8xf32>
    %52 = arith.truncf %51 : vector<16x8xf32> to vector<16x8xbf16>
    %53 = tpu.transpose %50, [1, 0] : vector<16x8xbf16> -> vector<8x16xbf16>
    %cst_13 = arith.constant dense<0.000000e+00> : vector<16x16xf32>
    %54 = tpu.matmul %48, %53, %cst_13 {dimension_numbers = #tpu.dot_dimension_numbers<[1], [0], [0], [1], [0, 0, 1, 1], [], []>} : vector<16x8xbf16>, vector<8x16xbf16>, vector<16x16xf32> -> vector<16x16xf32>
    %55 = arith.addf %54, %4 : vector<16x16xf32>
    %cst_14 = arith.constant dense<0xFF800000> : vector<16xf32>
    %56 = vector.multi_reduction <maximumf>, %55, %cst_14 [1] : vector<16x16xf32> to vector<16xf32>
    %57 = vector.shape_cast %56 : vector<16xf32> to vector<16x1xf32>
    %58 = vector.broadcast %57 : vector<16x1xf32> to vector<16x16xf32>
    %59 = arith.subf %55, %58 : vector<16x16xf32>
    %60 = math.exp %59 : vector<16x16xf32>
    %cst_15 = arith.constant dense<0.000000e+00> : vector<16xf32>
    %61 = vector.multi_reduction <add>, %60, %cst_15 [1] : vector<16x16xf32> to vector<16xf32>
    %62 = vector.shape_cast %61 : vector<16xf32> to vector<16x1xf32>
    %63 = tpu.reciprocal %62 {approx = true} : vector<16x1xf32> -> vector<16x1xf32>
    %64 = vector.broadcast %63 : vector<16x1xf32> to vector<16x16xf32>
    %65 = arith.mulf %60, %64 : vector<16x16xf32>
    %66 = arith.truncf %65 : vector<16x16xf32> to vector<16x16xbf16>
    %cst_16 = arith.constant dense<0.000000e+00> : vector<16x8xf32>
    %67 = tpu.matmul %66, %52, %cst_16 {dimension_numbers = #tpu.dot_dimension_numbers<[1], [0], [0], [1], [0, 0, 1, 1], [], []>} : vector<16x16xbf16>, vector<16x8xbf16>, vector<16x8xf32> -> vector<16x8xf32>
    %68 = vector.extract_strided_slice %3 {offsets = [0, 24], sizes = [16, 8], strides = [1, 1]} : vector<16x96xf32> to vector<16x8xf32>
    %69 = arith.truncf %68 : vector<16x8xf32> to vector<16x8xbf16>
    %70 = vector.extract_strided_slice %3 {offsets = [0, 56], sizes = [16, 8], strides = [1, 1]} : vector<16x96xf32> to vector<16x8xf32>
    %71 = arith.truncf %70 : vector<16x8xf32> to vector<16x8xbf16>
    %72 = vector.extract_strided_slice %3 {offsets = [0, 88], sizes = [16, 8], strides = [1, 1]} : vector<16x96xf32> to vector<16x8xf32>
    %73 = arith.truncf %72 : vector<16x8xf32> to vector<16x8xbf16>
    %74 = tpu.transpose %71, [1, 0] : vector<16x8xbf16> -> vector<8x16xbf16>
    %cst_17 = arith.constant dense<0.000000e+00> : vector<16x16xf32>
    %75 = tpu.matmul %69, %74, %cst_17 {dimension_numbers = #tpu.dot_dimension_numbers<[1], [0], [0], [1], [0, 0, 1, 1], [], []>} : vector<16x8xbf16>, vector<8x16xbf16>, vector<16x16xf32> -> vector<16x16xf32>
    %76 = arith.addf %75, %4 : vector<16x16xf32>
    %cst_18 = arith.constant dense<0xFF800000> : vector<16xf32>
    %77 = vector.multi_reduction <maximumf>, %76, %cst_18 [1] : vector<16x16xf32> to vector<16xf32>
    %78 = vector.shape_cast %77 : vector<16xf32> to vector<16x1xf32>
    %79 = vector.broadcast %78 : vector<16x1xf32> to vector<16x16xf32>
    %80 = arith.subf %76, %79 : vector<16x16xf32>
    %81 = math.exp %80 : vector<16x16xf32>
    %cst_19 = arith.constant dense<0.000000e+00> : vector<16xf32>
    %82 = vector.multi_reduction <add>, %81, %cst_19 [1] : vector<16x16xf32> to vector<16xf32>
    %83 = vector.shape_cast %82 : vector<16xf32> to vector<16x1xf32>
    %84 = tpu.reciprocal %83 {approx = true} : vector<16x1xf32> -> vector<16x1xf32>
    %85 = vector.broadcast %84 : vector<16x1xf32> to vector<16x16xf32>
    %86 = arith.mulf %81, %85 : vector<16x16xf32>
    %87 = arith.truncf %86 : vector<16x16xf32> to vector<16x16xbf16>
    %cst_20 = arith.constant dense<0.000000e+00> : vector<16x8xf32>
    %88 = tpu.matmul %87, %73, %cst_20 {dimension_numbers = #tpu.dot_dimension_numbers<[1], [0], [0], [1], [0, 0, 1, 1], [], []>} : vector<16x16xbf16>, vector<16x8xbf16>, vector<16x8xf32> -> vector<16x8xf32>
    %89 = tpu.concatenate %25, %46, %67, %88 in 1 : vector<16x8xf32>, vector<16x8xf32>, vector<16x8xf32>, vector<16x8xf32> -> vector<16x32xf32>
    %90 = arith.truncf %89 : vector<16x32xf32> to vector<16x32xbf16>
    %c0_21 = arith.constant 0 : index
    %c0_22 = arith.constant 0 : index
    %91 = vector.load %arg2[%c0_21, %c0_22] : memref<32x32xbf16, #tpu.memory_space<vmem>>, vector<32x32xbf16>
    %cst_23 = arith.constant dense<0.000000e+00> : vector<16x32xf32>
    %92 = tpu.matmul %90, %91, %cst_23 {dimension_numbers = #tpu.dot_dimension_numbers<[1], [0], [0], [1], [0, 0, 1, 1], [], []>} : vector<16x32xbf16>, vector<32x32xbf16>, vector<16x32xf32> -> vector<16x32xf32>
    %c0_24 = arith.constant 0 : index
    %c0_25 = arith.constant 0 : index
    %93 = vector.load %arg3[%c0_24, %c0_25] : memref<1x32xf32, #tpu.memory_space<vmem>>, vector<1x32xf32>
    %94 = vector.broadcast %93 : vector<1x32xf32> to vector<16x32xf32>
    %95 = arith.addf %92, %94 : vector<16x32xf32>
    %c0_26 = arith.constant 0 : index
    %c0_27 = arith.constant 0 : index
    %96 = vector.load %arg5[%c0_26, %c0_27] : memref<16x32xf32, #tpu.memory_space<vmem>>, vector<16x32xf32>
    tpu.vector_store %arg5[%c0_26, %c0_27], %95 {strides = array<i32>} : memref<16x32xf32, #tpu.memory_space<vmem>>, vector<16x32xf32>,
    return
  }
}

</mosaic_0001>

<bundles_post_ra>
// kernel: tpu_custom_call.1
= control target key start
LH: loop header
LB: loop body
LE: loop exit
PB: predicated region body
PF: predicated region fallthrough
CT: control target
= control target key end

     0   :  { %10 = vsyncpa [#allocation3], 0  ;;  %s859_s0 = inlined_call_operand.hbm [shape: f32[16,32], index: 0, kind: input, shape index: {}]   ;;  %s860_s1 = inlined_call_operand.hbm [shape: bf16[32,96], index: 1, kind: input, shape index: {}]   ;;  %s861_s2 = inlined_call_operand.hbm [shape: bf16[32,32], index: 2, kind: input, shape index: {}]   ;;  %s862_s3 = inlined_call_operand.vmem [shape: f32[1,32], index: 3, kind: input, shape index: {}]   ;;  %s863_s4 = inlined_call_operand.hbm [shape: f32[16,16], index: 4, kind: input, shape index: {}]   ;;  %s864_s5 = inlined_call_operand.hbm [shape: f32[16,32], index: 5, kind: output, shape index: {}]  }
   0x1   :  { %11 = vsyncpa [#allocation6], 0 }
   0x2   :  { %12 = vsyncpa [#allocation9], 0  ;;  %s31_s20 = sshll.u32 %s860_s1, 4  ;;  %s32_s20 = int_to_ptr.hbm [resolvable:$true] %s31_s20 }
   0x3   :  { %13 = vsyncpa [#allocation4], 0  ;;  %s713_s21 = smov [#allocation5]   ;;  %s18_s25 = sshll.u32 %s859_s0, 4  ;;  %s19_s25 = int_to_ptr.hbm [resolvable:$true] %s18_s25 }
   0x4   :  { %s33_s22 = sshll.u32 %s713_s21, 4  ;;  %s714_s26 = smov 64   ;;  %s34_s22 = int_to_ptr.vmem [resolvable:$true] %s33_s22 }
   0x5   :  { %s715_s27 = smov 4   ;;  %s716_s28 = smov [#allocation2]  }
   0x6   :  { %39 = dma.hbm_to_vmem [thread:$0]  %s32_s20, 256, %s34_s22, [#allocation6], %s714_s26, %s714_s26, %s715_s27  }
   0x7   :  { %s20_s29 = sshll.u32 %s716_s28, 4  ;;  %s717_s30 = smov 128   ;;  %s21_s29 = int_to_ptr.vmem [resolvable:$true] %s20_s29 }
   0x8   :  { %s718_s1 = smov 8   ;;  %s44_s8 = sshll.u32 %s861_s2, 4  ;;  %s45_s8 = int_to_ptr.hbm [resolvable:$true] %s44_s8 }
   0x9   :  { %26 = dma.hbm_to_vmem [thread:$0]  %s19_s25, 256, %s21_s29, [#allocation3], %s717_s30, %s717_s30, %s718_s1  }
   0xa   :  { %s719_s0 = smov [#allocation7]   ;;  %s59_s12 = sshll.u32 %s863_s4, 4  ;;  %s60_s12 = int_to_ptr.hbm [resolvable:$true] %s59_s12 }
   0xb   :  { %s46_s9 = sshll.u32 %s719_s0, 4  ;;  %s720_s13 = smov [#allocation8]   ;;  %s47_s9 = int_to_ptr.vmem [resolvable:$true] %s46_s9 }
   0xc   :  { %52 = dma.hbm_to_vmem [thread:$0]  %s45_s8, 256, %s47_s9, [#allocation6], %s714_s26, %s714_s26, %s715_s27  }
   0xd   :  { %s61_s14 = sshll.u32 %s720_s13, 4  ;;  %s62_s14 = int_to_ptr.vmem [resolvable:$true] %s61_s14 }
   0xe   :  { %67 = dma.hbm_to_vmem [thread:$0]  %s60_s12, 256, %s62_s14, [#allocation9], %s717_s30, %s717_s30, %s718_s1  }
   0xf   :  { %705 = dma.done.wait [#allocation3], 256  }
  0x10   :  { %706 = vsyncadd [#allocation3], 4294967040 }
  0x11   :  { %707 = dma.done.wait [#allocation6], 512  }
  0x12   :  { %708 = vsyncadd [#allocation6], 4294966784 }
  0x13   :  { %709 = dma.done.wait [#allocation9], 256  }
  0x14   :  { %710 = vsyncadd [#allocation9], 4294967040  ;;  %v513_v0 = vld [vmem:[#allocation5 + $0x8] sm:$0xff]  ;;  %v512_v1 = vld [vmem:[#allocation5] sm:$0xff]  ;;  %vm104_vm0 = vcmask 261120   ;;  %s721_s2 = smov 104  }
  0x15   :  { %114 = vmatpush.bf16.msra.mxu0 %v513_v0  ;;  %v85_v2 = vld [vmem:[#allocation2] sm:$0xff]  ;;  %v86_v3 = vld [vmem:[#allocation2 + $0x8] sm:$0xff]  ;;  %s722_s4 = smov 120   ;;  %s723_s15 = smov 96   ;;  %vm128_vm1 = vcmask 64512   ;;  %v122_v19 = vld [vmem:[#allocation8] sm:$0xff] }
  0x16   :  { %v87_v4 = vpack.c.bf16 %v86_v3, %v85_v2  ;;  %s724_s16 = smov 80   ;;  %s725_s17 = smov 72   ;;  %vm149_vm2 = vcmask 130048   ;;  %v123_v23 = vld [vmem:[#allocation8 + $0x8] sm:$0xff]  ;;  %vm422_vm3 = vcmask 195584  }
  0x17   :  { %s726_s18 = smov 88   ;;  %s727_s19 = smov 112  }
  0x18   :  { %s728_s20 = smov 56   ;;  %s729_s21 = smov 40  }
  0x19   :  { %115 = vmatpush.bf16.msra.mxu0 %v512_v1  ;;  %s730_s22 = smov 48   ;;  %s731_s23 = smov 24  }
  0x1a   :  { %s732_s24 = smov 16   ;;  %s733_s27 = smov [#allocation10]  }
  0x1b   :  { %s469_s28 = sshll.u32 %s733_s27, 4  ;;  %s471_s7 = sshll.u32 %s864_s5, 4  ;;  %s470_s28 = int_to_ptr.vmem [resolvable:$true] %s469_s28  ;;  %s472_s7 = int_to_ptr.hbm [resolvable:$true] %s471_s7 }
  0x1c   :  { %494 = vmatmul.msk.bf16.vlgmr.msra.gmra.mxu0 %vm104_vm0, %v87_v4 }
  0x99   :  { %v117_v5 = vpop.f32.mrf.mxu0 }
  0xa1   :  { %v119_v6 = vpop.f32.mrf.mxu0 }
  0xa2   :  { %v787_v7 = vpack.c.bf16 %v119_v6, %v117_v5 }
  0xa4   :  { %327 = vrot.lane.b32.xlu2 %v787_v7, %s721_s2  ;;  %193 = vrot.lane.b32.xlu1 %v787_v7, %s722_s4 }
  0xa5   :  { %126 = vrot.lane.b32.xlu0 %v787_v7, %s723_s15 }
  0xac   :  { %262 = vrot.lane.b32.xlu2 %v787_v7, %s724_s16  ;;  %329 = vrot.lane.b32.xlu1 %v787_v7, %s725_s17 }
  0xad   :  { %195 = vrot.lane.b32.xlu0 %v787_v7, %s726_s18 }
  0xb5   :  { %260 = vrot.lane.b32.xlu0 %v787_v7, %s727_s19 }
  0xfe   :  { %v328_v8 = vpop.permute.xlu2 %327 }
 0x106   :  { %v263_v9 = vpop.permute.xlu2 %262 }
 0x107   :  { %v268_v10 = vsel %vm128_vm1, %v263_v9, 0 }
 0x108   :  { %277 = vmatpush.bf16.xpose.msrb.mxu0 %v268_v10 }
 0x116   :  { %v194_v11 = vpop.permute.xlu1 %193 }
 0x117   :  { %v127_v12 = vpop.permute.xlu0 %126 }
 0x118   :  { %v133_v13 = vsel %vm128_vm1, %v127_v12, 0 }
 0x119   :  { %142 = vmatpush.bf16.xpose.msra.mxu1 %v133_v13 }
 0x11e   :  { %v330_v14 = vpop.permute.xlu1 %329 }
 0x11f   :  { %v196_v15 = vpop.permute.xlu0 %195  ;;  %v335_v16 = vsel %vm128_vm1, %v330_v14, 0 }
 0x120   :  { %495 = vmatmul.msk.bf16.vlgmr.msra.gmra.mxu1 %vm128_vm1, %v787_v7  ;;  %v201_v17 = vsel %vm128_vm1, %v196_v15, 0 }
 0x121   :  { %210 = vmatpush.bf16.xpose.msra.mxu3 %v201_v17 }
 0x127   :  { %v261_v18 = vpop.permute.xlu0 %260 }
 0x128   :  { %497 = vmatmul.msk.bf16.vlgmr.msra.gmra.mxu3 %vm128_vm1, %v194_v11  ;;  %499 = vmatmul.msk.bf16.vlgmr.msrb.gmra.mxu0 %vm128_vm1, %v261_v18 }
 0x129   :  { %344 = vmatpush.bf16.xpose.msrb.mxu3 %v335_v16 }
 0x138   :  { %501 = vmatmul.msk.bf16.vlgmr.msrb.gmra.mxu3 %vm128_vm1, %v328_v8 }
 0x19d   :  { %v144_v20 = vpop.f32.mrf.mxu1 }
 0x19e   :  { %v145_v21 = vadd.f32 %v144_v20, %v122_v19 }
 0x1a0   :  { %v150_v22 = vsel %vm149_vm2, %v145_v21, -inf }
 0x1a1   :  { %151 = vmax.xlane.f32.xlu1 %v150_v22 }
 0x1a5   :  { %v146_v24 = vpop.f32.mrf.mxu1  ;;  %v279_v25 = vpop.f32.mrf.mxu0 }
 0x1a6   :  { %v147_v26 = vadd.f32 %v146_v24, %v123_v23  ;;  %v280_v27 = vadd.f32 %v279_v25, %v122_v19 }
 0x1a8   :  { %v153_v28 = vsel %vm149_vm2, %v147_v26, -inf  ;;  %v284_v29 = vsel %vm149_vm2, %v280_v27, -inf }
 0x1a9   :  { %154 = vmax.xlane.f32.xlu2 %v153_v28  ;;  %285 = vmax.xlane.f32.xlu0 %v284_v29 }
 0x1ab   :  { %v212_v30 = vpop.f32.mrf.mxu3 }
 0x1ac   :  { %v213_v31 = vadd.f32 %v212_v30, %v122_v19 }
 0x1ad   :  { %v281_v32 = vpop.f32.mrf.mxu0 }
 0x1ae   :  { %v282_v33 = vadd.f32 %v281_v32, %v123_v23  ;;  %v217_v35 = vsel %vm149_vm2, %v213_v31, -inf }
 0x1b0   :  { %v287_v34 = vsel %vm149_vm2, %v282_v33, -inf }
 0x1b1   :  { %288 = vmax.xlane.f32.xlu1 %v287_v34  ;;  %218 = vmax.xlane.f32.xlu0 %v217_v35 }
 0x1b3   :  { %v214_v36 = vpop.f32.mrf.mxu3 }
 0x1b4   :  { %v215_v37 = vadd.f32 %v214_v36, %v123_v23 }
 0x1b6   :  { %v220_v38 = vsel %vm149_vm2, %v215_v37, -inf }
 0x1b7   :  { %221 = vmax.xlane.f32.xlu2 %v220_v38 }
 0x1bb   :  { %v346_v39 = vpop.f32.mrf.mxu3 }
 0x1bc   :  { %v347_v40 = vadd.f32 %v346_v39, %v122_v19 }
 0x1be   :  { %v351_v41 = vsel %vm149_vm2, %v347_v40, -inf }
 0x1bf   :  { %352 = vmax.xlane.f32.xlu1 %v351_v41 }
 0x1c3   :  { %v348_v42 = vpop.f32.mrf.mxu3 }
 0x1c4   :  { %v349_v43 = vadd.f32 %v348_v42, %v123_v23 }
 0x1c6   :  { %v354_v44 = vsel %vm149_vm2, %v349_v43, -inf }
 0x1c7   :  { %355 = vmax.xlane.f32.xlu2 %v354_v44 }
 0x1d8   :  { %173 = vrot.lane.b32.xlu1 %v787_v7, %s714_s26 }
 0x1df   :  { %240 = vrot.lane.b32.xlu2 %v787_v7, %s728_s20 }
 0x214   :  { %v152_v45 = vpop.xlane.xlu1 %151 }
 0x215   :  { %v156_v46 = vsub.f32 %v145_v21, %v152_v45 }
 0x217   :  { %v158_v47 = vmul.f32 1.442695, %v156_v46 }
 0x219   :  { %553 = vpow2.f32 %v158_v47 }
 0x21c   :  { %v155_v48 = vpop.xlane.xlu2 %154  ;;  %v286_v49 = vpop.xlane.xlu0 %285 }
 0x21d   :  { %v157_v50 = vsub.f32 %v147_v26, %v155_v48  ;;  %v290_v51 = vsub.f32 %v280_v27, %v286_v49 }
 0x21f   :  { %v816_v52 = vpop.eup %553  ;;  %v160_v53 = vmul.f32 1.442695, %v157_v50  ;;  %v292_v54 = vmul.f32 1.442695, %v290_v51 }
 0x220   :  { %v162_v55 = vsel %vm149_vm2, %v816_v52, 0.0 }
 0x221   :  { %555 = vpow2.f32 %v160_v53  ;;  %163 = vadd.xlane.f32.xlu2 %v162_v55 }
 0x222   :  { %557 = vpow2.f32 %v292_v54 }
 0x224   :  { %v289_v56 = vpop.xlane.xlu1 %288  ;;  %v219_v57 = vpop.xlane.xlu0 %218 }
 0x225   :  { %v291_v58 = vsub.f32 %v282_v33, %v289_v56  ;;  %v223_v59 = vsub.f32 %v213_v31, %v219_v57 }
 0x227   :  { %v556_v60 = vpop.eup %555  ;;  %v294_v61 = vmul.f32 1.442695, %v291_v58  ;;  %v225_v62 = vmul.f32 1.442695, %v223_v59 }
 0x228   :  { %v820_v63 = vpop.eup %557  ;;  %v165_v0 = vsel %vm149_vm2, %v556_v60, 0.0 }
 0x229   :  { %559 = vpow2.f32 %v294_v61  ;;  %166 = vadd.xlane.f32.xlu0 %v165_v0  ;;  %v296_v1 = vsel %vm149_vm2, %v820_v63, 0.0  ;;  %v515_v0 = vld [vmem:[#allocation7 + $0x8] sm:$0xff] }
 0x22a   :  { %561 = vpow2.f32 %v225_v62  ;;  %297 = vadd.xlane.f32.xlu1 %v296_v1  ;;  %v222_v2 = vpop.xlane.xlu2 %221  ;;  %455 = vmatpush.bf16.msra.mxu0 %v515_v0  ;;  %v514_v1 = vld [vmem:[#allocation7] sm:$0xff] }
 0x22b   :  { %v224_v3 = vsub.f32 %v215_v37, %v222_v2 }
 0x22d   :  { %v227_v4 = vmul.f32 1.442695, %v224_v3 }
 0x22e   :  { %456 = vmatpush.bf16.msra.mxu0 %v514_v1 }
 0x22f   :  { %v825_v5 = vpop.eup %559  ;;  %563 = vpow2.f32 %v227_v4 }
 0x230   :  { %v562_v6 = vpop.eup %561  ;;  %v299_v8 = vsel %vm149_vm2, %v825_v5, 0.0 }
 0x231   :  { %300 = vadd.xlane.f32.xlu0 %v299_v8  ;;  %v229_v9 = vsel %vm149_vm2, %v562_v6, 0.0 }
 0x232   :  { %230 = vadd.xlane.f32.xlu2 %v229_v9  ;;  %v353_v10 = vpop.xlane.xlu1 %352 }
 0x233   :  { %v357_v11 = vsub.f32 %v347_v40, %v353_v10 }
 0x235   :  { %v564_v12 = vpop.eup %563  ;;  %v359_v13 = vmul.f32 1.442695, %v357_v11 }
 0x236   :  { %v232_v14 = vsel %vm149_vm2, %v564_v12, 0.0 }
 0x237   :  { %565 = vpow2.f32 %v359_v13 }
 0x239   :  { %233 = vadd.xlane.f32.xlu0 %v232_v14 }
 0x23a   :  { %v356_v15 = vpop.xlane.xlu2 %355 }
 0x23b   :  { %v358_v16 = vsub.f32 %v349_v43, %v356_v15 }
 0x23d   :  { %v566_v17 = vpop.eup %565  ;;  %v361_v18 = vmul.f32 1.442695, %v358_v16 }
 0x23e   :  { %v363_v19 = vsel %vm149_vm2, %v566_v17, 0.0 }
 0x23f   :  { %567 = vpow2.f32 %v361_v18 }
 0x241   :  { %364 = vadd.xlane.f32.xlu0 %v363_v19  ;;  %v552_v19 = vld [vmem:[%s862_s3] ss:$0 sm:$0xff] }
 0x242   :  { %v241_v23 = vpop.permute.xlu2 %240 }
 0x245   :  { %v568_v20 = vpop.eup %567 }
 0x246   :  { %v366_v21 = vsel %vm149_vm2, %v568_v20, 0.0 }
 0x249   :  { %367 = vadd.xlane.f32.xlu0 %v366_v21 }
 0x24a   :  { %374 = vrot.lane.b32.xlu2 %v787_v7, %s729_s21  ;;  %v174_v22 = vpop.permute.xlu1 %173 }
 0x24b   :  { %186 = vmatpush.bf16.msra.mxu2 %v174_v22 }
 0x24f   :  { %253 = vmatpush.bf16.msrb.mxu2 %v241_v23 }
 0x25d   :  { %307 = vrot.lane.b32.xlu0 %v787_v7, %s730_s22 }
 0x294   :  { %v164_v24 = vpop.xlane.xlu2 %163 }
 0x295   :  { %569 = vrcp.f32 %v164_v24 }
 0x29b   :  { %v570_v26 = vpop.eup %569 }
 0x29c   :  { %v167_v25 = vpop.xlane.xlu0 %166  ;;  %v170_v29 = vmul.f32 %v570_v26, %v816_v52 }
 0x29d   :  { %571 = vrcp.f32 %v167_v25  ;;  %v298_v43 = vpop.xlane.xlu1 %297 }
 0x2a3   :  { %v572_v27 = vpop.eup %571 }
 0x2a4   :  { %v301_v28 = vpop.xlane.xlu0 %300  ;;  %v171_v30 = vmul.f32 %v572_v27, %v556_v60 }
 0x2a5   :  { %v231_v31 = vpop.xlane.xlu2 %230 }
 0x2a6   :  { %v172_v32 = vpack.c.bf16 %v171_v30, %v170_v29  ;;  %573 = vrcp.f32 %v231_v31 }
 0x2a8   :  { %496 = vmatmul.msk.bf16.vlgmr.msra.gmra.mxu2 %vm149_vm2, %v172_v32 }
 0x2ac   :  { %v234_v33 = vpop.xlane.xlu0 %233  ;;  %v574_v7 = vpop.eup %573 }
 0x2ad   :  { %v375_v34 = vpop.permute.xlu2 %374  ;;  %575 = vrcp.f32 %v234_v33  ;;  %v237_v36 = vmul.f32 %v574_v7, %v562_v6 }
 0x2ae   :  { %387 = vmatpush.bf16.msra.mxu2 %v375_v34 }
 0x2b3   :  { %v576_v35 = vpop.eup %575 }
 0x2b4   :  { %v238_v37 = vmul.f32 %v576_v35, %v564_v12  ;;  %v365_v38 = vpop.xlane.xlu0 %364 }
 0x2b5   :  { %577 = vrcp.f32 %v365_v38 }
 0x2b6   :  { %v239_v39 = vpack.c.bf16 %v238_v37, %v237_v36 }
 0x2b8   :  { %498 = vmatmul.msk.bf16.vlgmr.msrb.gmra.mxu2 %vm149_vm2, %v239_v39 }
 0x2bb   :  { %v578_v41 = vpop.eup %577 }
 0x2bc   :  { %v368_v40 = vpop.xlane.xlu0 %367  ;;  %v371_v44 = vmul.f32 %v578_v41, %v566_v17 }
 0x2bd   :  { %579 = vrcp.f32 %v368_v40 }
 0x2be   :  { %581 = vrcp.f32 %v301_v28 }
 0x2bf   :  { %583 = vrcp.f32 %v298_v43 }
 0x2c3   :  { %v580_v42 = vpop.eup %579 }
 0x2c4   :  { %v372_v45 = vmul.f32 %v580_v42, %v568_v20  ;;  %v582_v47 = vpop.eup %581 }
 0x2c5   :  { %v584_v48 = vpop.eup %583  ;;  %v305_v49 = vmul.f32 %v582_v47, %v825_v5 }
 0x2c6   :  { %v373_v46 = vpack.c.bf16 %v372_v45, %v371_v44  ;;  %v304_v50 = vmul.f32 %v584_v48, %v820_v63 }
 0x2c8   :  { %502 = vmatmul.msk.bf16.vlgmr.msra.gmra.mxu2 %vm149_vm2, %v373_v46  ;;  %v306_v52 = vpack.c.bf16 %v305_v49, %v304_v50 }
 0x2cf   :  { %v308_v51 = vpop.permute.xlu0 %307 }
 0x2d0   :  { %320 = vmatpush.bf16.msrb.mxu1 %v308_v51 }
 0x2d3   :  { %500 = vmatmul.msk.bf16.vlgmr.msrb.gmra.mxu1 %vm149_vm2, %v306_v52 }
 0x32b   :  { %v188_v53 = vpop.f32.mrf.mxu2 }
 0x333   :  { %v190_v54 = vpop.f32.mrf.mxu2 }
 0x33b   :  { %v255_v55 = vpop.f32.mrf.mxu2 }
 0x343   :  { %v257_v56 = vpop.f32.mrf.mxu2 }
 0x344   :  { %v537_v57 = vpack.i.bf16 %v257_v56, %v255_v55 }
 0x346   :  { %538 = vrot.lane.b32.xlu2 %v537_v57, %s718_s1 }
 0x34b   :  { %v389_v58 = vpop.f32.mrf.mxu2 }
 0x350   :  { %v322_v59 = vpop.f32.mrf.mxu1 }
 0x353   :  { %v391_v60 = vpop.f32.mrf.mxu2 }
 0x354   :  { %v547_v61 = vpack.i.bf16 %v391_v60, %v389_v58 }
 0x356   :  { %548 = vrot.lane.b32.xlu0 %v547_v61, %s731_s23 }
 0x358   :  { %v324_v62 = vpop.f32.mrf.mxu1 }
 0x359   :  { %v542_v63 = vpack.i.bf16 %v324_v62, %v322_v59 }
 0x35b   :  { %543 = vrot.lane.b32.xlu2 %v542_v63, %s732_s24 }
 0x3a0   :  { %v539_v2 = vpop.permute.xlu2 %538 }
 0x3a1   :  { %v541_v4 = vunpack.i.h.bf16 %v539_v2  ;;  %v540_v5 = vunpack.i.l.bf16 %v539_v2 }
 0x3a3   :  { %v419_v10 = vsel %vm128_vm1, %v190_v54, %v541_v4  ;;  %v418_v11 = vsel %vm128_vm1, %v188_v53, %v540_v5 }
 0x3b5   :  { %v544_v3 = vpop.permute.xlu2 %543 }
 0x3b6   :  { %v546_v6 = vunpack.i.h.bf16 %v544_v3  ;;  %v545_v8 = vunpack.i.l.bf16 %v544_v3 }
 0x3b8   :  { %v421_v14 = vsel %vm149_vm2, %v419_v10, %v546_v6  ;;  %v420_v15 = vsel %vm149_vm2, %v418_v11, %v545_v8 }
 0x3c8   :  { %v549_v9 = vpop.permute.xlu0 %548 }
 0x3c9   :  { %v551_v12 = vunpack.i.h.bf16 %v549_v9  ;;  %v550_v13 = vunpack.i.l.bf16 %v549_v9 }
 0x3cb   :  { %v424_v16 = vsel %vm422_vm3, %v421_v14, %v551_v12  ;;  %v423_v17 = vsel %vm422_vm3, %v420_v15, %v550_v13 }
 0x3cc   :  { %v425_v18 = vpack.c.bf16 %v424_v16, %v423_v17 }
 0x3ce   :  { %511 = vmatmul.msk.bf16.vlgmr.msra.gmra.mxu0 %vm104_vm0, %v425_v18 }
 0x44b   :  { %v458_v20 = vpop.f32.mrf.mxu0 }
 0x44c   :  { %v459_v21 = vadd.f32 %v552_v19, %v458_v20 }
 0x44e   :  { %463 = vst.msk [vmem:[#allocation10] sm:$0xff] %vm104_vm0, %v459_v21 }
 0x453   :  { %v460_v22 = vpop.f32.mrf.mxu0 }
 0x454   :  { %v461_v23 = vadd.f32 %v552_v19, %v460_v22 }
 0x456   :  { %464 = vst.msk [vmem:[#allocation10 + $0x8] sm:$0xff] %vm104_vm0, %v461_v23 }
 0x457   :  { %477 = dma.vmem_to_hbm [thread:$0]  %s470_s28, 256, %s472_s7, [#allocation4], %s717_s30, %s717_s30, %s718_s1  }
 0x458   :  { %711 = dma.done.wait [#allocation4], 256  }
 0x459   :  { %712 = vsyncadd [#allocation4], 4294967040 }
 0x45a   :  { %482 = vsyncpa [#allocation3], 1 }
 0x45b   :  { %483 = vsyncpa [#allocation6], 1 }
 0x45c   :  { %484 = vsyncpa [#allocation9], 1 }
 0x45d   :  { %485 = vsyncpa [#allocation4], 1 }

</bundles_post_ra>
